<compile_context>
chip_gen: v6e
topology: v6e:2x2x1
jax: 0.10.0
libtpu: 0.0.40
codegen_flags: <defaults>
</compile_context>

<pallas_src>
import jax
import jax.numpy as jnp
from jax.experimental import pallas as pl
from jax.experimental.pallas import tpu as pltpu

TARGET_DTYPE = jnp.float32   # the `dtype` argument of the module (test param)


def _default_tm():
    # Bigger tiles only help v7x (per-step overhead vs. 3.2 TB/s HBM); keep
    # 2 MiB tiles on v5e (16 MiB scoped VMEM) and v6e (already ~86% roofline).
    try:
        kind = jax.devices()[0].device_kind.lower()
    except Exception:  # pragma: no cover - defensive; default is always safe
        kind = ""
    return 2048 if "v7" in kind else 1024


_TM = _default_tm()


def _relu_inplace_kernel(x_ref, o_ref):
    # x1 = x.to(dtype); relu_(x1).  Single output; wrapper aliases y and x1.
    x1 = x_ref[...].astype(TARGET_DTYPE)
    o_ref[...] = jnp.maximum(x1, jnp.zeros((), TARGET_DTYPE))


@jax.jit
def unary_func_op_inplace_forward(x):
    """Returns (y, x1) matching the PyTorch module with op=F.relu, dtype=float32.

    In-place semantics: y and x1 are the same buffer, so the same array is
    returned twice.
    """
    orig_shape = x.shape
    total = x.size

    # Degenerate: empty tensor (would otherwise make tm == 0).
    if total == 0:
        y = x.astype(TARGET_DTYPE)
        return y, y

    # Pick a lane-dense last dim that divides the element count exactly so the
    # hot path needs no pad and no trailing slice (each would add ~2N bytes of
    # HBM traffic to a kernel whose ideal cost is 2N).
    lanes = 0
    for cand in (512, 256, 128):
        if total % cand == 0:
            lanes = cand
            break
    if lanes == 0:
        # Ragged element count: leave the elementwise op to XLA (fused, same
        # 2N-byte traffic; a pallas launch buys nothing here).
        # TODO(synk): in-kernel ragged-tail handling via masked stores.
        y = jnp.maximum(x.astype(TARGET_DTYPE), jnp.zeros((), TARGET_DTYPE))
        return y, y

    rows = total // lanes
    x2d = x.reshape(rows, lanes)          # free metadata reshape under jit

    # Tile selection.
    if rows <= _TM:
        if rows > 1024:
            # v7x only (since _TM == 2048 there): split into >=2 blocks so the
            # second TensorCore is not idle on mid-sized inputs.
            half = (rows + 1) // 2
            tm = max(8, ((half + 7) // 8) * 8)     # keep (8,128) alignment
        else:
            tm = rows                              # single full-dims block
    else:
        tm = _TM                                   # multiple of 8 -> legal

    grid = (pl.cdiv(rows, tm),)                    # ragged last block is fine

    itemsize = jnp.dtype(x2d.dtype).itemsize
    cost = pl.CostEstimate(
        flops=rows * lanes,
        transcendentals=0,
        bytes_accessed=rows * lanes * (itemsize + jnp.dtype(TARGET_DTYPE).itemsize),
    )

    y2d = pl.pallas_call(
        _relu_inplace_kernel,
        out_shape=jax.ShapeDtypeStruct((rows, lanes), TARGET_DTYPE),
        grid=grid,
        in_specs=[pl.BlockSpec((tm, lanes), lambda i: (i, 0))],
        out_specs=pl.BlockSpec((tm, lanes), lambda i: (i, 0)),
        compiler_params=pltpu.CompilerParams(
            dimension_semantics=("parallel",)),
        cost_estimate=cost,
    )(x2d)

    y = y2d.reshape(orig_shape)
    # y and x1 alias the same tensor under in-place semantics.
    return y, y


if __name__ == "__main__":
    key = jax.random.PRNGKey(0)
    # Small NCHW input consistent with the test's random image-like tensors.
    x = jax.random.normal(key, (2, 4, 16, 16), dtype=jnp.float32)

    # Reference computed up front (the in-place contract says the caller's
    # tensor is overwritten, so don't rely on x after a donating call).
    ref = jnp.maximum(x.astype(TARGET_DTYPE), 0.0)

    y, x1 = unary_func_op_inplace_forward(x)
    jax.block_until_ready((y, x1))

    assert y.shape == x.shape and x1.shape == x.shape
    assert y.dtype == TARGET_DTYPE and x1.dtype == TARGET_DTYPE
    assert jnp.allclose(y, ref), "y mismatch"
    assert jnp.allclose(x1, ref), "x1 (inplace-mutated input) mismatch"

    print("KERNEL_OK")
</pallas_src>

<mosaic_0001>
module attributes {stable_mosaic.version = 11 : i64} {
  func.func @_relu_inplace_kernel(%arg0: i32, %arg1: memref<4x512xf32, #tpu.memory_space<vmem>>, %arg2: memref<4x512xf32, #tpu.memory_space<vmem>>) attributes {dimension_semantics = [#tpu.dimension_semantics<parallel>], iteration_bounds = array<i64: 1>, scalar_prefetch = 0 : i64, scratch_operands = 0 : i64, tpu.core_type = #tpu.core_type<tc>, window_params = [{transform_indices = @transform_0, window_bounds = array<i64: 4, 512>}, {transform_indices = @transform_1, window_bounds = array<i64: 4, 512>}]} {
    %c0 = arith.constant 0 : index
    %c0_0 = arith.constant 0 : index
    %0 = vector.load %arg1[%c0, %c0_0] : memref<4x512xf32, #tpu.memory_space<vmem>>, vector<4x512xf32>
    %cst = arith.constant 0.000000e+00 : f32
    %1 = vector.broadcast %cst : f32 to vector<4x512xf32>
    %2 = arith.maximumf %0, %1 : vector<4x512xf32>
    %c0_1 = arith.constant 0 : index
    %c0_2 = arith.constant 0 : index
    %3 = vector.load %arg2[%c0_1, %c0_2] : memref<4x512xf32, #tpu.memory_space<vmem>>, vector<4x512xf32>
    tpu.vector_store %arg2[%c0_1, %c0_2], %2 {strides = array<i32>} : memref<4x512xf32, #tpu.memory_space<vmem>>, vector<4x512xf32>,
    return
  }
  func.func @transform_0(%arg0: i32) -> (i32, i32) {
    %c0_i32 = arith.constant 0 : i32
    %c0_i32_0 = arith.constant 0 : i32
    return %arg0, %c0_i32 : i32, i32
  }
  func.func @transform_1(%arg0: i32) -> (i32, i32) {
    %c0_i32 = arith.constant 0 : i32
    %c0_i32_0 = arith.constant 0 : i32
    return %arg0, %c0_i32 : i32, i32
  }
}

</mosaic_0001>

<bundles_post_ra>
// kernel: unary_func_op_inplace_forward.1
= control target key start
LH: loop header
LB: loop body
LE: loop exit
PB: predicated region body
PF: predicated region fallthrough
CT: control target
= control target key end

     0   :  { %s40_s0 = inlined_call_operand.vmem [shape: f32[4,512], index: 0, kind: input, shape index: {}]   ;;  %s41_s1 = inlined_call_operand.vmem [shape: f32[4,512], index: 1, kind: output, shape index: {}]  }
   0x1   :  { %v8_v0 = vld [vmem:[%s40_s0] sm:$0xff]  ;;  %v9_v1 = vld [vmem:[%s40_s0 + $0x8] sm:$0xff] }
   0x2   :  { %v10_v2 = vmax.f32 %v8_v0, 0.0  ;;  %v11_v3 = vmax.f32 %v9_v1, 0.0 }
   0x4   :  { %12 = vst [vmem:[%s41_s1] sm:$0xff] %v10_v2  ;;  %13 = vst [vmem:[%s41_s1 + $0x8] sm:$0xff] %v11_v3 }

</bundles_post_ra>
